<compile_context>
chip_gen: v7x
topology: tpu7x:2x2x1
jax: 0.10.0
libtpu: 0.0.40
codegen_flags: <defaults>
</compile_context>

<pallas_src>
import jax
import jax.numpy as jnp
from jax.experimental import pallas as pl
from jax.experimental.pallas import tpu as pltpu


def _expand_weight(w_oihw):
    """Fold conv3x3 + PixelUnshuffle(2) into one (16*Cin, 4*Cout) matmul weight.

    K index = (gi*2 + gj) * 4*Cin + (pr*2 + pc) * Cin + cin, where (gi, pr) / (gj, pc)
    are the row/col (group, parity) of the 4x4 stride-2 window in *padded* input
    coordinates (this matches the kernel's im2col layout).
    N index = c*4 + i*2 + j  (exactly PyTorch's PixelUnshuffle channel order).
    """
    Cout, Cin, KH, KW = w_oihw.shape
    assert (KH, KW) == (3, 3)
    w_hwio = jnp.transpose(w_oihw, (2, 3, 1, 0))               # (3, 3, Cin, Cout)
    w6 = jnp.zeros((4, 4, Cin, Cout, 2, 2), w_oihw.dtype)      # [di, dj, cin, c, i, j]
    for i in range(2):
        for j in range(2):
            # Output phase (i, j) sees conv tap (kh, kw) at window offset (i+kh, j+kw).
            w6 = w6.at[i:i + 3, j:j + 3, :, :, i, j].set(w_hwio)
    w8 = w6.reshape(2, 2, 2, 2, Cin, Cout, 2, 2)               # [gi, pr, gj, pc, cin, c, i, j]
    w8 = jnp.transpose(w8, (0, 2, 1, 3, 4, 5, 6, 7))           # [gi, gj, pr, pc, cin, c, i, j]
    return w8.reshape(16 * Cin, 4 * Cout)


def _fused_conv_unshuffle_kernel(x_ref, w_ref, o_ref, xp_ref, im_ref):
    # x_ref : (1, H, Wo, 2*Cin)   input with column parity folded into lanes
    #                             (channel = col_parity*Cin + cin).
    # w_ref : (16*Cin, 4*Cout)    expanded conv+unshuffle weight.
    # o_ref : (1, Ho, Wo, 4*Cout) fused output, channel = c*4 + i*2 + j (torch order).
    # xp_ref: (Ho+1, Wo+1, 4*Cin) zero-padded, both parities folded into lanes:
    #                             channel = (pad_row_par*2 + pad_col_par)*Cin + cin.
    # im_ref: (Ho, Wo, 16*Cin)    im2col of the 4x4 stride-2 windows.
    Ho = o_ref.shape[1]
    Wo = o_ref.shape[2]
    Cin = x_ref.shape[3] // 2

    # Split row parity with a layout-preserving leading-dim reshape (last two dims untouched).
    x = x_ref[0, :, :, :].reshape(Ho, 2, Wo, 2 * Cin)
    x_r0 = x[:, 0, :, :]             # even input rows  (Ho, Wo, 2*Cin)
    x_r1 = x[:, 1, :, :]             # odd  input rows  (Ho, Wo, 2*Cin)

    # In-VMEM zero padding (replaces the old host-side jnp.pad HBM pass).
    xp_ref[...] = jnp.zeros(xp_ref.shape, xp_ref.dtype)
    # Padded parity (pr, pc) holds original parity (1-pr, 1-pc) shifted by the pad row/col:
    xp_ref[1:Ho + 1, 1:Wo + 1, 0 * Cin:1 * Cin] = x_r1[:, :, Cin:2 * Cin]   # (pr,pc)=(0,0)
    xp_ref[1:Ho + 1, 0:Wo,     1 * Cin:2 * Cin] = x_r1[:, :, 0:Cin]         # (pr,pc)=(0,1)
    xp_ref[0:Ho,     1:Wo + 1, 2 * Cin:3 * Cin] = x_r0[:, :, Cin:2 * Cin]   # (pr,pc)=(1,0)
    xp_ref[0:Ho,     0:Wo,     3 * Cin:4 * Cin] = x_r0[:, :, 0:Cin]         # (pr,pc)=(1,1)

    # im2col: the 4x4 stride-2 window of every output pixel is just 4 shifted
    # full-channel views of xp  ->  contraction dim K = 16*Cin.
    for t, (gi, gj) in enumerate(((0, 0), (0, 1), (1, 0), (1, 1))):
        im_ref[:, :, t * 4 * Cin:(t + 1) * 4 * Cin] = xp_ref[gi:gi + Ho, gj:gj + Wo, :]

    # Single MXU matmul (f32 accumulation); output lanes are already in
    # PixelUnshuffle channel order, so the store is as lane-dense as this op allows.
    o_ref[0, :, :, :] = jnp.einsum(
        "hwk,kn->hwn", im_ref[...], w_ref[...],
        preferred_element_type=jnp.float32).astype(o_ref.dtype)


def downsample(x_nchw, w_oihw):
    """Forward of Downsample: Conv2d(n_feat, n_feat//2, 3, 1, 1, bias=False) + PixelUnshuffle(2)."""
    B, Cin, H, W = x_nchw.shape
    Cout = w_oihw.shape[0]
    assert H % 2 == 0 and W % 2 == 0, "PixelUnshuffle(2) needs even spatial dims"
    Ho, Wo = H // 2, W // 2

    # Single unavoidable layout pass (module contract is NCHW, kernel wants channels-last);
    # the following reshape is free (contiguous trailing-dim split/merge, no data movement).
    x_nhwc = jnp.transpose(x_nchw, (0, 2, 3, 1))                 # (B, H, W, Cin)
    xw = x_nhwc.reshape(B, H, Wo, 2 * Cin)                       # col parity -> lanes (free)
    w2 = _expand_weight(w_oihw).astype(x_nchw.dtype)             # (16*Cin, 4*Cout)

    # TODO(synk): for large spatial sizes add row-strip tiling with a 1-row halo
    # (manual DMA / overlapping blocks); at these sizes one image per grid step fits VMEM.
    y = pl.pallas_call(
        _fused_conv_unshuffle_kernel,
        out_shape=jax.ShapeDtypeStruct((B, Ho, Wo, 4 * Cout), x_nchw.dtype),
        grid_spec=pltpu.PrefetchScalarGridSpec(
            num_scalar_prefetch=0,
            grid=(B,),
            in_specs=[
                pl.BlockSpec((1, H, Wo, 2 * Cin), lambda b: (b, 0, 0, 0)),
                pl.BlockSpec((16 * Cin, 4 * Cout), lambda b: (0, 0)),
            ],
            out_specs=pl.BlockSpec((1, Ho, Wo, 4 * Cout), lambda b: (b, 0, 0, 0)),
            scratch_shapes=[
                pltpu.VMEM((Ho + 1, Wo + 1, 4 * Cin), x_nchw.dtype),
                pltpu.VMEM((Ho, Wo, 16 * Cin), x_nchw.dtype),
            ],
        ),
        compiler_params=pltpu.CompilerParams(
            dimension_semantics=("parallel",),
            vmem_limit_bytes=32 * 1024 * 1024,
        ),
    )(xw, w2)

    # Kernel output already carries the PixelUnshuffle channel order; one transpose
    # to NCHW finishes the op (no separate unshuffle pass).
    return jnp.transpose(y, (0, 3, 1, 2))


def _pixel_unshuffle_nchw_ref(x, r=2):
    """Matches torch.nn.PixelUnshuffle: (B,C,H,W) -> (B, C*r*r, H//r, W//r)."""
    B, C, H, W = x.shape
    x = x.reshape(B, C, H // r, r, W // r, r)
    x = x.transpose(0, 1, 3, 5, 2, 4)
    return x.reshape(B, C * r * r, H // r, W // r)


if __name__ == "__main__":
    B, n_feat, H, W = 2, 4, 16, 16
    key = jax.random.PRNGKey(0)
    kx, kw = jax.random.split(key)
    x = jax.random.normal(kx, (B, n_feat, H, W), dtype=jnp.float32)
    # Conv2d(n_feat, n_feat//2, 3, bias=False) weight: (Cout=n_feat//2, Cin=n_feat, 3, 3)
    w = jax.random.normal(kw, (n_feat // 2, n_feat, 3, 3), dtype=jnp.float32) * 0.1

    out = jax.block_until_ready(downsample(x, w))
    assert out.shape == (B, n_feat * 2, H // 2, W // 2), out.shape

    # Pure-JAX reference (conv in NCHW/OIHW exactly like PyTorch, then PixelUnshuffle).
    ref_conv = jax.lax.conv_general_dilated(
        x, w, window_strides=(1, 1), padding=((1, 1), (1, 1)),
        dimension_numbers=("NCHW", "OIHW", "NCHW"))
    ref = _pixel_unshuffle_nchw_ref(ref_conv, 2)
    assert jnp.allclose(out, ref, atol=1e-3, rtol=1e-3), \
        float(jnp.max(jnp.abs(out - ref)))

    print("KERNEL_OK")
</pallas_src>

<mosaic_0001>
module attributes {stable_mosaic.version = 11 : i64} {
  func.func @_fused_conv_unshuffle_kernel(%arg0: i32, %arg1: memref<1x16x8x8xf32, #tpu.memory_space<vmem>>, %arg2: memref<64x8xf32, #tpu.memory_space<vmem>>, %arg3: memref<1x8x8x8xf32, #tpu.memory_space<vmem>>, %arg4: memref<9x9x16xf32, #tpu.memory_space<vmem>>, %arg5: memref<8x8x64xf32, #tpu.memory_space<vmem>>) attributes {dimension_semantics = [#tpu.dimension_semantics<parallel>], iteration_bounds = array<i64: 2>, scalar_prefetch = 0 : i64, scratch_operands = 2 : i64, tpu.core_type = #tpu.core_type<tc>, window_params = [{transform_indices = @transform_0, window_bounds = array<i64: 1, 16, 8, 8>}, {pipeline_mode = #tpu.pipeline_mode<synchronous>, transform_indices = @transform_1, window_bounds = array<i64: 64, 8>}, {transform_indices = @transform_2, window_bounds = array<i64: 1, 8, 8, 8>}]} {
    %c0 = arith.constant 0 : index
    %c0_0 = arith.constant 0 : index
    %c0_1 = arith.constant 0 : index
    %c0_2 = arith.constant 0 : index
    %0 = vector.load %arg1[%c0, %c0_0, %c0_1, %c0_2] : memref<1x16x8x8xf32, #tpu.memory_space<vmem>>, vector<1x16x8x8xf32>
    %1 = vector.shape_cast %0 : vector<1x16x8x8xf32> to vector<16x8x8xf32>
    %2 = vector.shape_cast %1 : vector<16x8x8xf32> to vector<8x2x8x8xf32>
    %3 = vector.extract_strided_slice %2 {offsets = [0, 0, 0, 0], sizes = [8, 1, 8, 8], strides = [1, 1, 1, 1]} : vector<8x2x8x8xf32> to vector<8x1x8x8xf32>
    %4 = vector.shape_cast %3 : vector<8x1x8x8xf32> to vector<8x8x8xf32>
    %5 = vector.extract_strided_slice %2 {offsets = [0, 1, 0, 0], sizes = [8, 1, 8, 8], strides = [1, 1, 1, 1]} : vector<8x2x8x8xf32> to vector<8x1x8x8xf32>
    %6 = vector.shape_cast %5 : vector<8x1x8x8xf32> to vector<8x8x8xf32>
    %cst = arith.constant 0.000000e+00 : f32
    %7 = vector.broadcast %cst : f32 to vector<9x9x16xf32>
    %c0_3 = arith.constant 0 : index
    %c0_4 = arith.constant 0 : index
    %c0_5 = arith.constant 0 : index
    %8 = vector.load %arg4[%c0_3, %c0_4, %c0_5] : memref<9x9x16xf32, #tpu.memory_space<vmem>>, vector<9x9x16xf32>
    tpu.vector_store %arg4[%c0_3, %c0_4, %c0_5], %7 {strides = array<i32>} : memref<9x9x16xf32, #tpu.memory_space<vmem>>, vector<9x9x16xf32>,
    %9 = vector.extract_strided_slice %6 {offsets = [0, 0, 4], sizes = [8, 8, 4], strides = [1, 1, 1]} : vector<8x8x8xf32> to vector<8x8x4xf32>
    %c1 = arith.constant 1 : index
    %c1_6 = arith.constant 1 : index
    %c0_7 = arith.constant 0 : index
    %10 = vector.load %arg4[%c1, %c1_6, %c0_7] : memref<9x9x16xf32, #tpu.memory_space<vmem>>, vector<8x8x4xf32>
    tpu.vector_store %arg4[%c1, %c1_6, %c0_7], %9 {strides = array<i32>} : memref<9x9x16xf32, #tpu.memory_space<vmem>>, vector<8x8x4xf32>,
    %11 = vector.extract_strided_slice %6 {offsets = [0, 0, 0], sizes = [8, 8, 4], strides = [1, 1, 1]} : vector<8x8x8xf32> to vector<8x8x4xf32>
    %c1_8 = arith.constant 1 : index
    %c0_9 = arith.constant 0 : index
    %c4 = arith.constant 4 : index
    %12 = vector.load %arg4[%c1_8, %c0_9, %c4] : memref<9x9x16xf32, #tpu.memory_space<vmem>>, vector<8x8x4xf32>
    tpu.vector_store %arg4[%c1_8, %c0_9, %c4], %11 {strides = array<i32>} : memref<9x9x16xf32, #tpu.memory_space<vmem>>, vector<8x8x4xf32>,
    %13 = vector.extract_strided_slice %4 {offsets = [0, 0, 4], sizes = [8, 8, 4], strides = [1, 1, 1]} : vector<8x8x8xf32> to vector<8x8x4xf32>
    %c0_10 = arith.constant 0 : index
    %c1_11 = arith.constant 1 : index
    %c8 = arith.constant 8 : index
    %14 = vector.load %arg4[%c0_10, %c1_11, %c8] : memref<9x9x16xf32, #tpu.memory_space<vmem>>, vector<8x8x4xf32>
    tpu.vector_store %arg4[%c0_10, %c1_11, %c8], %13 {strides = array<i32>} : memref<9x9x16xf32, #tpu.memory_space<vmem>>, vector<8x8x4xf32>,
    %15 = vector.extract_strided_slice %4 {offsets = [0, 0, 0], sizes = [8, 8, 4], strides = [1, 1, 1]} : vector<8x8x8xf32> to vector<8x8x4xf32>
    %c0_12 = arith.constant 0 : index
    %c0_13 = arith.constant 0 : index
    %c12 = arith.constant 12 : index
    %16 = vector.load %arg4[%c0_12, %c0_13, %c12] : memref<9x9x16xf32, #tpu.memory_space<vmem>>, vector<8x8x4xf32>
    tpu.vector_store %arg4[%c0_12, %c0_13, %c12], %15 {strides = array<i32>} : memref<9x9x16xf32, #tpu.memory_space<vmem>>, vector<8x8x4xf32>,
    %c0_14 = arith.constant 0 : index
    %c0_15 = arith.constant 0 : index
    %c0_16 = arith.constant 0 : index
    %17 = vector.load %arg4[%c0_14, %c0_15, %c0_16] : memref<9x9x16xf32, #tpu.memory_space<vmem>>, vector<8x8x16xf32>
    %c0_17 = arith.constant 0 : index
    %c0_18 = arith.constant 0 : index
    %c0_19 = arith.constant 0 : index
    %18 = vector.load %arg5[%c0_17, %c0_18, %c0_19] : memref<8x8x64xf32, #tpu.memory_space<vmem>>, vector<8x8x16xf32>
    tpu.vector_store %arg5[%c0_17, %c0_18, %c0_19], %17 {strides = array<i32>} : memref<8x8x64xf32, #tpu.memory_space<vmem>>, vector<8x8x16xf32>,
    %c0_20 = arith.constant 0 : index
    %c1_21 = arith.constant 1 : index
    %c0_22 = arith.constant 0 : index
    %19 = vector.load %arg4[%c0_20, %c1_21, %c0_22] : memref<9x9x16xf32, #tpu.memory_space<vmem>>, vector<8x8x16xf32>
    %c0_23 = arith.constant 0 : index
    %c0_24 = arith.constant 0 : index
    %c16 = arith.constant 16 : index
    %20 = vector.load %arg5[%c0_23, %c0_24, %c16] : memref<8x8x64xf32, #tpu.memory_space<vmem>>, vector<8x8x16xf32>
    tpu.vector_store %arg5[%c0_23, %c0_24, %c16], %19 {strides = array<i32>} : memref<8x8x64xf32, #tpu.memory_space<vmem>>, vector<8x8x16xf32>,
    %c1_25 = arith.constant 1 : index
    %c0_26 = arith.constant 0 : index
    %c0_27 = arith.constant 0 : index
    %21 = vector.load %arg4[%c1_25, %c0_26, %c0_27] : memref<9x9x16xf32, #tpu.memory_space<vmem>>, vector<8x8x16xf32>
    %c0_28 = arith.constant 0 : index
    %c0_29 = arith.constant 0 : index
    %c32 = arith.constant 32 : index
    %22 = vector.load %arg5[%c0_28, %c0_29, %c32] : memref<8x8x64xf32, #tpu.memory_space<vmem>>, vector<8x8x16xf32>
    tpu.vector_store %arg5[%c0_28, %c0_29, %c32], %21 {strides = array<i32>} : memref<8x8x64xf32, #tpu.memory_space<vmem>>, vector<8x8x16xf32>,
    %c1_30 = arith.constant 1 : index
    %c1_31 = arith.constant 1 : index
    %c0_32 = arith.constant 0 : index
    %23 = vector.load %arg4[%c1_30, %c1_31, %c0_32] : memref<9x9x16xf32, #tpu.memory_space<vmem>>, vector<8x8x16xf32>
    %c0_33 = arith.constant 0 : index
    %c0_34 = arith.constant 0 : index
    %c48 = arith.constant 48 : index
    %24 = vector.load %arg5[%c0_33, %c0_34, %c48] : memref<8x8x64xf32, #tpu.memory_space<vmem>>, vector<8x8x16xf32>
    tpu.vector_store %arg5[%c0_33, %c0_34, %c48], %23 {strides = array<i32>} : memref<8x8x64xf32, #tpu.memory_space<vmem>>, vector<8x8x16xf32>,
    %c0_35 = arith.constant 0 : index
    %c0_36 = arith.constant 0 : index
    %c0_37 = arith.constant 0 : index
    %25 = vector.load %arg5[%c0_35, %c0_36, %c0_37] : memref<8x8x64xf32, #tpu.memory_space<vmem>>, vector<8x8x64xf32>
    %c0_38 = arith.constant 0 : index
    %c0_39 = arith.constant 0 : index
    %26 = vector.load %arg2[%c0_38, %c0_39] : memref<64x8xf32, #tpu.memory_space<vmem>>, vector<64x8xf32>
    "tpu.trace_start"() <{level = 10 : i32, message = "hwk,kn->hwn"}> : () -> ()
    %cst_40 = arith.constant dense<0.000000e+00> : vector<8x8x8xf32>
    %27 = tpu.matmul %25, %26, %cst_40 {dimension_numbers = #tpu.dot_dimension_numbers<[2], [0], [0, 1], [1], [0, 0, 0, 1, 1, 1], [], []>} : vector<8x8x64xf32>, vector<64x8xf32>, vector<8x8x8xf32> -> vector<8x8x8xf32>
    "tpu.trace_stop"() : () -> ()
    %c0_41 = arith.constant 0 : index
    %c0_42 = arith.constant 0 : index
    %c0_43 = arith.constant 0 : index
    %c0_44 = arith.constant 0 : index
    %28 = vector.load %arg3[%c0_41, %c0_42, %c0_43, %c0_44] : memref<1x8x8x8xf32, #tpu.memory_space<vmem>>, vector<1x8x8x8xf32>
    %29 = vector.shape_cast %28 : vector<1x8x8x8xf32> to vector<8x8x8xf32>
    %30 = vector.shape_cast %27 : vector<8x8x8xf32> to vector<1x8x8x8xf32>
    tpu.vector_store %arg3[%c0_41, %c0_42, %c0_43, %c0_44], %30 {strides = array<i32>} : memref<1x8x8x8xf32, #tpu.memory_space<vmem>>, vector<1x8x8x8xf32>,
    return
  }
  func.func @transform_0(%arg0: i32) -> (i32, i32, i32, i32) {
    %c0_i32 = arith.constant 0 : i32
    %c0_i32_0 = arith.constant 0 : i32
    %c0_i32_1 = arith.constant 0 : i32
    %c0_i32_2 = arith.constant 0 : i32
    return %arg0, %c0_i32, %c0_i32_0, %c0_i32_1 : i32, i32, i32, i32
  }
  func.func @transform_1(%arg0: i32) -> (i32, i32) {
    %c0_i32 = arith.constant 0 : i32
    %c0_i32_0 = arith.constant 0 : i32
    %c0_i32_1 = arith.constant 0 : i32
    return %c0_i32, %c0_i32_0 : i32, i32
  }
  func.func @transform_2(%arg0: i32) -> (i32, i32, i32, i32) {
    %c0_i32 = arith.constant 0 : i32
    %c0_i32_0 = arith.constant 0 : i32
    %c0_i32_1 = arith.constant 0 : i32
    %c0_i32_2 = arith.constant 0 : i32
    return %arg0, %c0_i32, %c0_i32_0, %c0_i32_1 : i32, i32, i32, i32
  }
}

</mosaic_0001>

<bundles_post_ra>
// kernel: tpu_custom_call.1
= control target key start
LH: loop header
LB: loop body
LE: loop exit
PB: predicated region body
PF: predicated region fallthrough
CT: control target
= control target key end

     0   :  { %7 = vsyncpa [#allocation5], 0  ;;  %s1249_s0 = inlined_call_operand.vmem [shape: f32[2,16,8,8], index: 0, kind: input, shape index: {}]   ;;  %s1250_s1 = inlined_call_operand.vmem [shape: f32[64,8], index: 1, kind: input, shape index: {}]   ;;  %s1251_s2 = inlined_call_operand.hbm [shape: f32[2,8,8,8], index: 2, kind: output, shape index: {}]  }
   0x1   :  { %9 = vsyncpa [#allocation5 + $0x1], 0  ;;  %s948_s9 = smov 0   ;;  %s950_s10 = smov 0  }
   0x2   :  { %s952_s11 = smov 0   ;;  %s954_s12 = smov 0  }
   0x3 LB: > { %s969_s13 = sadd.s32 4294967295, %s921_s12   ;;  %s721_s14 = sadd.s32 4294967294, %s921_s12   ;;  %s921_s12 = sphi %s954_s12, %s1257_s12   ;;  %s917_s11 = sphi %s952_s11, %s1256_s11   ;;  %s913_s10 = sphi %s950_s10, %s1255_s10   ;;  %s909_s9 = sphi %s948_s9, %s1254_s9  }
   0x4   : > { %s973_s15 = sadd.s32 1, %s921_s12   ;;  %s69_s16 = sadd.s32 1, %s917_s11 }
   0x5   : > { %s66_s17 = ssub.s32 %s921_s12, %s973_s15  ;;  %p79_p0 = scmp.ne.s32.totalorder %s917_s11, %s913_s10 }
   0x6   : > { %p67_p1 = scmp.eq.s32.totalorder %s66_s17, 0  ;;  %p80_p2 = scmp.eq.s32.totalorder %s969_s13, 1 }
   0x7   : > { %p85_p3 = scmp.ne.s32.totalorder %s913_s10, %s909_s9  ;;  %p86_p4 = scmp.eq.s32.totalorder %s721_s14, 1 }
   0x8   : > { %s984_s18 = scalar_select %p67_p1, %s917_s11, %s69_s16  }
   0x9   : > { %p986_p5 = por %p80_p2, %p79_p0  ;;  %p990_p6 = por %p86_p4, %p85_p3 }
   0xa   : > { %p724_p7 = scmp.ge.s32.totalorder %s921_s12, 1  ;;  %p115_p8 = scmp.lt.s32.totalorder %s921_s12, 3 }
   0xc   : > { %p116_p9 = pnand %p724_p7, %p115_p8 }
   0xd   : > { %p137_p10 = scmp.lt.s32.totalorder (!%p116_p9), %s969_s13, 1  ;;  %vm158_vm0 = vcmask (!%p116_p9), 130048   ;;  %vm160_vm1 = vcmask (!%p116_p9), 122880   ;;  %v923_v0 = vmov (!%p116_p9), 0.0   ;;  %s924_s26 = smov (!%p116_p9), 124   ;;  %vm211_vm2 = vcmask (!%p116_p9), 31744  }
   0xe   : > { %119 = sbr.rel (%p116_p9) target bundleno = 604 (0x25c), region = 28  ;;  %170 = vst.msk [vmem:[#allocation2 + $0x50] sm:$0xff] (!%p116_p9), %vm158_vm0, %v923_v0  ;;  %159 = vst.msk [vmem:[#allocation2] sm:$0xff] (!%p116_p9), %vm158_vm0, %v923_v0  ;;  %s925_s27 = smov (!%p116_p9), 4   ;;  %vm244_vm3 = vcmask (!%p116_p9), 64544   ;;  %vm285_vm4 = vcmask (!%p116_p9), 97344  }
   0xf   : > { %171 = vst.msk [vmem:[#allocation2 + $0x58] sm:$0x1] (!%p116_p9), %vm160_vm1, %v923_v0  ;;  %161 = vst.msk [vmem:[#allocation2 + $0x8] sm:$0x1] (!%p116_p9), %vm160_vm1, %v923_v0  ;;  %s926_s28 = smov (!%p116_p9), 12   ;;  %vm318_vm5 = vcmask (!%p116_p9), 130144  }
  0x10   : > { %162 = vst.msk [vmem:[#allocation2 + $0x10] sm:$0xff] (!%p116_p9), %vm158_vm0, %v923_v0  ;;  %164 = vst.msk [vmem:[#allocation2 + $0x20] sm:$0xff] (!%p116_p9), %vm158_vm0, %v923_v0  ;;  %s927_s29 = smov (!%p116_p9), 16   ;;  %v498_v40 = vld [vmem:[%s1250_s1] sm:$0xff] (!%p116_p9)  ;;  %v499_v41 = vld [vmem:[%s1250_s1 + $0x8] sm:$0xff] (!%p116_p9)  ;;  %s928_s23 = smov (!%p116_p9), 32  }
  0x11   : > { %163 = vst.msk [vmem:[#allocation2 + $0x18] sm:$0x1] (!%p116_p9), %vm160_vm1, %v923_v0  ;;  %165 = vst.msk [vmem:[#allocation2 + $0x28] sm:$0x1] (!%p116_p9), %vm160_vm1, %v923_v0  ;;  %v787_v42 = vpack.c.bf16 (!%p116_p9), %v499_v41, %v498_v40  ;;  %v500_v45 = vld [vmem:[%s1250_s1 + $0x10] sm:$0xff] (!%p116_p9)  ;;  %v501_v46 = vld [vmem:[%s1250_s1 + $0x18] sm:$0xff] (!%p116_p9) }
  0x12   : > { %166 = vst.msk [vmem:[#allocation2 + $0x30] sm:$0xff] (!%p116_p9), %vm158_vm0, %v923_v0  ;;  %168 = vst.msk [vmem:[#allocation2 + $0x40] sm:$0xff] (!%p116_p9), %vm158_vm0, %v923_v0  ;;  %v791_v47 = vpack.c.bf16 (!%p116_p9), %v501_v46, %v500_v45  ;;  %v502_v53 = vld [vmem:[%s1250_s1 + $0x20] sm:$0xff] (!%p116_p9)  ;;  %v503_v54 = vld [vmem:[%s1250_s1 + $0x28] sm:$0xff] (!%p116_p9)  ;;  %vm383_vm6 = vcmask (!%p116_p9), 261248   ;;  %vm432_vm7 = vcmask (!%p116_p9), 392448  }
  0x13   : > { %167 = vst.msk [vmem:[#allocation2 + $0x38] sm:$0x1] (!%p116_p9), %vm160_vm1, %v923_v0  ;;  %169 = vst.msk [vmem:[#allocation2 + $0x48] sm:$0x1] (!%p116_p9), %vm160_vm1, %v923_v0  ;;  %788 = vmatprep.subr.bf16.mxu0 (!%p116_p9), %v787_v42  ;;  %803 = vmatprep.subr.bf16.mxu1 (!%p116_p9), %v787_v42  ;;  %v795_v55 = vpack.c.bf16 (!%p116_p9), %v503_v54, %v502_v53  ;;  %v504_v58 = vld [vmem:[%s1250_s1 + $0x30] sm:$0xff] (!%p116_p9)  ;;  %v505_v59 = vld [vmem:[%s1250_s1 + $0x38] sm:$0xff] (!%p116_p9) }
  0x14   : > { %172 = vst.msk [vmem:[#allocation2 + $0x60] sm:$0xff] (!%p116_p9), %vm158_vm0, %v923_v0  ;;  %174 = vst.msk [vmem:[#allocation2 + $0x70] sm:$0xff] (!%p116_p9), %vm158_vm0, %v923_v0  ;;  %790 = vmatpush3.bf16.msra.mxu0 (!%p116_p9), %v787_v42  ;;  %807 = vmatpush3.bf16.msra.mxu1 (!%p116_p9), %v787_v42  ;;  %v799_v60 = vpack.c.bf16 (!%p116_p9), %v505_v59, %v504_v58  ;;  %vm481_vm8 = vcmask (!%p116_p9), 523648   ;;  %vm506_vm9 = vcmask (!%p116_p9), 523264   ;;  %vm636_vm10 = vcmask (!%p116_p9), 64512   ;;  %s742_s4 = sshll.u32 (!%p116_p9), %s969_s13, 10 }
  0x15   : > { %173 = vst.msk [vmem:[#allocation2 + $0x68] sm:$0x1] %vm160_vm1, %v923_v0  ;;  %175 = vst.msk [vmem:[#allocation2 + $0x78] sm:$0x1] %vm160_vm1, %v923_v0  ;;  %s138_s21 = scalar_select %p137_p10, %s969_s13, 1  ;;  %792 = vmatprep.subr.bf16.mxu0 %v791_v47  ;;  %804 = vmatprep.subr.bf16.mxu1 %v791_v47 }
  0x16   : > { %176 = vst.msk [vmem:[#allocation2 + $0x80] sm:$0xff] %vm158_vm0, %v923_v0  ;;  %s1202_s8 = scalar_lea.hbm %s1251_s2, %s742_s4  ;;  %s930_s16 = smov [#allocation4]  }
  0x17   : > { %177 = vst.msk [vmem:[#allocation2 + $0x88] sm:$0x1] %vm160_vm1, %v923_v0  ;;  %s741_s22 = sshll.u32 %s138_s21, 7  ;;  %s863_s17 = sshll.u32 %s930_s16, 4  ;;  %s864_s17 = int_to_ptr.vmem [resolvable:$false] %s863_s17 }
  0x18   : > { %s1021_s25 = scalar_lea.vmem %s1249_s0, %s741_s22  ;;  %794 = vmatpush3.bf16.msra.mxu0 %v791_v47  ;;  %808 = vmatpush3.bf16.msra.mxu1 %v791_v47  ;;  %s865_s21 = scalar_lea.vmem %s864_s17, 2048 }
  0x19   : > { %v151_v1 = vld [vmem:[%s1021_s25 + $0x48] sm:$0xff]  ;;  %v149_v2 = vld [vmem:[%s1021_s25 + $0x38] sm:$0xff]  ;;  %v150_v6 = vld [vmem:[%s1021_s25 + $0x40] sm:$0xff]  ;;  %796 = vmatprep.subr.bf16.mxu0 %v795_v55  ;;  %805 = vmatprep.subr.bf16.mxu1 %v795_v55 }
  0x1a   : > { %194 = vrot.lane.b32.xlu1 %v151_v1, %s924_s26  ;;  %192 = vrot.lane.b32.xlu0 %v149_v2, %s924_s26  ;;  %v143_v3 = vld [vmem:[%s1021_s25 + $0x8] sm:$0xff]  ;;  %v153_v4 = vld [vmem:[%s1021_s25 + $0x58] sm:$0xff] }
  0x1b   : > { %v145_v5 = vld [vmem:[%s1021_s25 + $0x18] sm:$0xff]  ;;  %v142_v7 = vld [vmem:[%s1021_s25] sm:$0xff]  ;;  %v152_v8 = vld [vmem:[%s1021_s25 + $0x50] sm:$0xff] }
  0x1c   : > { %v144_v9 = vld [vmem:[%s1021_s25 + $0x10] sm:$0xff]  ;;  %v154_v10 = vld [vmem:[%s1021_s25 + $0x60] sm:$0xff]  ;;  %v155_v12 = vld [vmem:[%s1021_s25 + $0x68] sm:$0xff]  ;;  %798 = vmatpush3.bf16.msra.mxu0 %v795_v55  ;;  %809 = vmatpush3.bf16.msra.mxu1 %v795_v55 }
  0x1d   : > { %v146_v11 = vld [vmem:[%s1021_s25 + $0x20] sm:$0xff]  ;;  %v147_v13 = vld [vmem:[%s1021_s25 + $0x28] sm:$0xff]  ;;  %v156_v14 = vld [vmem:[%s1021_s25 + $0x70] sm:$0xff]  ;;  %800 = vmatprep.subr.bf16.mxu0 %v799_v60  ;;  %806 = vmatprep.subr.bf16.mxu1 %v799_v60 }
  0x1e   : > { %226 = vrot.lane.b32.xlu1 %v149_v2, %s925_s27  ;;  %186 = vrot.lane.b32.xlu0 %v143_v3, %s924_s26  ;;  %v148_v15 = vld [vmem:[%s1021_s25 + $0x30] sm:$0xff]  ;;  %v157_v16 = vld [vmem:[%s1021_s25 + $0x78] sm:$0xff] }
  0x20   : > { %802 = vmatpush3.bf16.msra.mxu0 %v799_v60  ;;  %810 = vmatpush3.bf16.msra.mxu1 %v799_v60 }
  0x22   : > { %196 = vrot.lane.b32.xlu1 %v153_v4, %s924_s26  ;;  %188 = vrot.lane.b32.xlu0 %v145_v5, %s924_s26 }
  0x26   : > { %228 = vrot.lane.b32.xlu1 %v151_v1, %s925_s27  ;;  %220 = vrot.lane.b32.xlu0 %v143_v3, %s925_s27 }
  0x2a   : > { %269 = vrot.lane.b32.xlu1 %v150_v6, %s925_s27  ;;  %261 = vrot.lane.b32.xlu0 %v142_v7, %s925_s27 }
  0x2e   : > { %230 = vrot.lane.b32.xlu1 %v153_v4, %s925_s27  ;;  %222 = vrot.lane.b32.xlu0 %v145_v5, %s925_s27 }
  0x32   : > { %271 = vrot.lane.b32.xlu1 %v152_v8, %s925_s27  ;;  %263 = vrot.lane.b32.xlu0 %v144_v9, %s925_s27 }
  0x36   : > { %302 = vrot.lane.b32.xlu1 %v150_v6, %s926_s28  ;;  %294 = vrot.lane.b32.xlu0 %v142_v7, %s926_s28 }
  0x3a   : > { %273 = vrot.lane.b32.xlu1 %v154_v10, %s925_s27  ;;  %265 = vrot.lane.b32.xlu0 %v146_v11, %s925_s27 }
  0x3e   : > { %304 = vrot.lane.b32.xlu1 %v152_v8, %s926_s28  ;;  %296 = vrot.lane.b32.xlu0 %v144_v9, %s926_s28 }
  0x42   : > { %198 = vrot.lane.b32.xlu1 %v155_v12, %s924_s26  ;;  %190 = vrot.lane.b32.xlu0 %v147_v13, %s924_s26 }
  0x46   : > { %306 = vrot.lane.b32.xlu1 %v154_v10, %s926_s28  ;;  %298 = vrot.lane.b32.xlu0 %v146_v11, %s926_s28 }
  0x4a   : > { %232 = vrot.lane.b32.xlu1 %v155_v12, %s925_s27  ;;  %224 = vrot.lane.b32.xlu0 %v147_v13, %s925_s27 }
  0x4e   : > { %275 = vrot.lane.b32.xlu1 %v156_v14, %s925_s27  ;;  %267 = vrot.lane.b32.xlu0 %v148_v15, %s925_s27 }
  0x52   : > { %300 = vrot.lane.b32.xlu1 %v148_v15, %s926_s28  ;;  %200 = vrot.lane.b32.xlu0 %v157_v16, %s924_s26 }
  0x56   : > { %234 = vrot.lane.b32.xlu1 %v157_v16, %s925_s27  ;;  %308 = vrot.lane.b32.xlu0 %v156_v14, %s926_s28  ;;  %s929_s28 = smov 48  }
  0x8c   : > { %v195_v17 = vpop.permute.xlu1 %194  ;;  %v193_v18 = vpop.permute.xlu0 %192 }
  0x8d   : > { %216 = vst.msk [vmem:[#allocation2 + $0x51] sm:$0xff] %vm211_vm2, %v195_v17  ;;  %215 = vst.msk [vmem:[#allocation2 + $0x41] sm:$0xff] %vm211_vm2, %v193_v18 }
  0x90   : > { %v227_v19 = vpop.permute.xlu1 %226  ;;  %v187_v20 = vpop.permute.xlu0 %186 }
  0x91   : > { %248 = vst.msk [vmem:[#allocation2 + $0x40] sm:$0xff] %vm244_vm3, %v227_v19 }
  0x92   : > { %212 = vst.msk [vmem:[#allocation2 + $0x11] sm:$0xff] %vm211_vm2, %v187_v20 }
  0x94   : > { %v197_v21 = vpop.permute.xlu1 %196  ;;  %v189_v22 = vpop.permute.xlu0 %188 }
  0x95   : > { %217 = vst.msk [vmem:[#allocation2 + $0x61] sm:$0xff] %vm211_vm2, %v197_v21  ;;  %213 = vst.msk [vmem:[#allocation2 + $0x21] sm:$0xff] %vm211_vm2, %v189_v22 }
  0x98   : > { %v229_v23 = vpop.permute.xlu1 %228  ;;  %v221_v24 = vpop.permute.xlu0 %220 }
  0x99   : > { %249 = vst.msk [vmem:[#allocation2 + $0x50] sm:$0xff] %vm244_vm3, %v229_v23  ;;  %245 = vst.msk [vmem:[#allocation2 + $0x10] sm:$0xff] %vm244_vm3, %v221_v24 }
  0x9c   : > { %v270_v25 = vpop.permute.xlu1 %269  ;;  %v262_v26 = vpop.permute.xlu0 %261 }
  0x9d   : > { %290 = vst.msk [vmem:[#allocation2 + $0x41] sm:$0xff] %vm285_vm4, %v270_v25  ;;  %286 = vst.msk [vmem:[#allocation2 + $0x1] sm:$0xff] %vm285_vm4, %v262_v26 }
  0xa0   : > { %v231_v27 = vpop.permute.xlu1 %230  ;;  %v223_v28 = vpop.permute.xlu0 %222 }
  0xa1   : > { %250 = vst.msk [vmem:[#allocation2 + $0x60] sm:$0xff] %vm244_vm3, %v231_v27  ;;  %246 = vst.msk [vmem:[#allocation2 + $0x20] sm:$0xff] %vm244_vm3, %v223_v28 }
  0xa4   : > { %v272_v29 = vpop.permute.xlu1 %271  ;;  %v264_v30 = vpop.permute.xlu0 %263 }
  0xa5   : > { %291 = vst.msk [vmem:[#allocation2 + $0x51] sm:$0xff] %vm285_vm4, %v272_v29  ;;  %287 = vst.msk [vmem:[#allocation2 + $0x11] sm:$0xff] %vm285_vm4, %v264_v30 }
  0xa8   : > { %v303_v31 = vpop.permute.xlu1 %302  ;;  %v295_v32 = vpop.permute.xlu0 %294 }
  0xa9   : > { %323 = vst.msk [vmem:[#allocation2 + $0x40] sm:$0xff] %vm318_vm5, %v303_v31  ;;  %319 = vst.msk [vmem:[#allocation2] sm:$0xff] %vm318_vm5, %v295_v32 }
  0xac   : > { %v274_v33 = vpop.permute.xlu1 %273  ;;  %v266_v34 = vpop.permute.xlu0 %265 }
  0xad   : > { %292 = vst.msk [vmem:[#allocation2 + $0x61] sm:$0xff] %vm285_vm4, %v274_v33  ;;  %288 = vst.msk [vmem:[#allocation2 + $0x21] sm:$0xff] %vm285_vm4, %v266_v34 }
  0xb0   : > { %v305_v35 = vpop.permute.xlu1 %304  ;;  %v297_v36 = vpop.permute.xlu0 %296  ;;  %v343_v37 = vld [vmem:[#allocation2 + $0x1] sm:$0xff] }
  0xb1   : > { %v1081_v38 = vld [vmem:[#allocation2 + $0x40] sm:$0xff]  ;;  %324 = vst.msk [vmem:[#allocation2 + $0x50] sm:$0xff] %vm318_vm5, %v305_v35  ;;  %320 = vst.msk [vmem:[#allocation2 + $0x10] sm:$0xff] %vm318_vm5, %v297_v36  ;;  %359 = vrot.lane.b32.xlu0 %v343_v37, %s927_s29 }
  0xb2   : > { %v327_v39 = vld [vmem:[#allocation2] sm:$0xff]  ;;  %339 = vst.msk [vmem:[#allocation3 + $0x20] sm:$0xff] %vm158_vm0, %v1081_v38 }
  0xb3   : > { %335 = vst.msk [vmem:[#allocation3] sm:$0xff] %vm158_vm0, %v327_v39  ;;  %v347_v10 = vld [vmem:[#allocation2 + $0x41] sm:$0xff] }
  0xb4   : > { %v199_v43 = vpop.permute.xlu1 %198  ;;  %v191_v44 = vpop.permute.xlu0 %190 }
  0xb5   : > { %218 = vst.msk [vmem:[#allocation2 + $0x71] sm:$0xff] %vm211_vm2, %v199_v43  ;;  %214 = vst.msk [vmem:[#allocation2 + $0x31] sm:$0xff] %vm211_vm2, %v191_v44 }
  0xb8   : > { %v307_v48 = vpop.permute.xlu1 %306  ;;  %v299_v49 = vpop.permute.xlu0 %298  ;;  %v344_v50 = vld [vmem:[#allocation2 + $0x11] sm:$0xff] }
  0xb9   : > { %v392_v51 = vld [vmem:[#allocation2 + $0x10] sm:$0xff]  ;;  %325 = vst.msk [vmem:[#allocation2 + $0x60] sm:$0xff] %vm318_vm5, %v307_v48  ;;  %321 = vst.msk [vmem:[#allocation2 + $0x20] sm:$0xff] %vm318_vm5, %v299_v49  ;;  %361 = vrot.lane.b32.xlu0 %v344_v50, %s927_s29 }
  0xba   : > { %v1106_v52 = vld [vmem:[#allocation2 + $0x50] sm:$0xff]  ;;  %336 = vst.msk [vmem:[#allocation3 + $0x8] sm:$0xff] %vm158_vm0, %v392_v51 }
  0xbb   : > { %340 = vst.msk [vmem:[#allocation3 + $0x28] sm:$0xff] %vm158_vm0, %v1106_v52  ;;  %v348_v11 = vld [vmem:[#allocation2 + $0x51] sm:$0xff] }
  0xbc   : > { %v233_v56 = vpop.permute.xlu1 %232  ;;  %v225_v57 = vpop.permute.xlu0 %224 }
  0xbd   : > { %251 = vst.msk [vmem:[#allocation2 + $0x70] sm:$0xff] %vm244_vm3, %v233_v56  ;;  %247 = vst.msk [vmem:[#allocation2 + $0x30] sm:$0xff] %vm244_vm3, %v225_v57  ;;  %408 = vrot.lane.b32.xlu0 %v392_v51, %s928_s23 }
  0xc0   : > { %v276_v61 = vpop.permute.xlu1 %275  ;;  %v268_v62 = vpop.permute.xlu0 %267  ;;  %v393_v63 = vld [vmem:[#allocation2 + $0x20] sm:$0xff] }
  0xc1   : > { %v397_v0 = vld [vmem:[#allocation2 + $0x60] sm:$0xff]  ;;  %293 = vst.msk [vmem:[#allocation2 + $0x71] sm:$0xff] %vm285_vm4, %v276_v61  ;;  %289 = vst.msk [vmem:[#allocation2 + $0x31] sm:$0xff] %vm285_vm4, %v268_v62  ;;  %410 = vrot.lane.b32.xlu0 %v393_v63, %s928_s23 }
  0xc2   : > { %337 = vst.msk [vmem:[#allocation3 + $0x10] sm:$0xff] %vm158_vm0, %v393_v63  ;;  %341 = vst.msk [vmem:[#allocation3 + $0x30] sm:$0xff] %vm158_vm0, %v397_v0  ;;  %v442_v5 = vld [vmem:[#allocation2 + $0x21] sm:$0xff] }
  0xc3   : > { %v446_v12 = vld [vmem:[#allocation2 + $0x61] sm:$0xff] }
  0xc4   : > { %v301_v1 = vpop.permute.xlu1 %300  ;;  %v201_v2 = vpop.permute.xlu0 %200 }
  0xc5   : > { %322 = vst.msk [vmem:[#allocation2 + $0x30] sm:$0xff] %vm318_vm5, %v301_v1  ;;  %457 = vrot.lane.b32.xlu0 %v344_v50, %s929_s28 }
  0xc6   : > { %219 = vst.msk [vmem:[#allocation2 + $0x81] sm:$0xff] %vm211_vm2, %v201_v2 }
  0xc8   : > { %v235_v3 = vpop.permute.xlu1 %234  ;;  %v309_v4 = vpop.permute.xlu0 %308 }
  0xc9   : > { %252 = vst.msk [vmem:[#allocation2 + $0x80] sm:$0xff] %vm244_vm3, %v235_v3  ;;  %459 = vrot.lane.b32.xlu0 %v442_v5, %s929_s28 }
  0xca   : > { %326 = vst.msk [vmem:[#allocation2 + $0x70] sm:$0xff] %vm318_vm5, %v309_v4 }
  0xcc   : > { %v394_v6 = vld [vmem:[#allocation2 + $0x30] sm:$0xff] }
  0xcd   : > { %363 = vrot.lane.b32.xlu0 %v442_v5, %s927_s29  ;;  %338 = vst.msk [vmem:[#allocation3 + $0x18] sm:$0xff] %vm158_vm0, %v394_v6  ;;  %v346_v7 = vld [vmem:[#allocation2 + $0x31] sm:$0xff] }
  0xd0   : > { %v399_v8 = vld [vmem:[#allocation2 + $0x80] sm:$0xff] }
  0xd1   : > { %v398_v9 = vld [vmem:[#allocation2 + $0x70] sm:$0xff]  ;;  %365 = vrot.lane.b32.xlu0 %v346_v7, %s927_s29  ;;  %422 = vrot.lane.b32.xlu1 %v399_v8, %s928_s23  ;;  %v448_v14 = vld [vmem:[#allocation2 + $0x81] sm:$0xff] }
  0xd2   : > { %342 = vst.msk [vmem:[#allocation3 + $0x38] sm:$0xff] %vm158_vm0, %v398_v9  ;;  %v350_v13 = vld [vmem:[#allocation2 + $0x71] sm:$0xff] }
  0xd5   : > { %412 = vrot.lane.b32.xlu0 %v394_v6, %s928_s23  ;;  %367 = vrot.lane.b32.xlu1 %v347_v10, %s927_s29 }
  0xd9   : > { %414 = vrot.lane.b32.xlu0 %v1081_v38, %s928_s23  ;;  %369 = vrot.lane.b32.xlu1 %v348_v11, %s927_s29 }
  0xdd   : > { %461 = vrot.lane.b32.xlu0 %v346_v7, %s929_s28  ;;  %416 = vrot.lane.b32.xlu1 %v1106_v52, %s928_s23 }
  0xe1   : > { %463 = vrot.lane.b32.xlu0 %v347_v10, %s929_s28  ;;  %418 = vrot.lane.b32.xlu1 %v397_v0, %s928_s23 }
  0xe5   : > { %465 = vrot.lane.b32.xlu1 %v348_v11, %s929_s28 }
  0xe9   : > { %467 = vrot.lane.b32.xlu1 %v446_v12, %s929_s28 }
  0xed   : > { %371 = vrot.lane.b32.xlu1 %v446_v12, %s927_s29 }
  0xf1   : > { %373 = vrot.lane.b32.xlu1 %v350_v13, %s927_s29  ;;  %s134_s29 = sand.u32 1, %s913_s10  }
  0xf2   : > { %s725_s30 = sshll.u32 %s134_s29, 6  ;;  %s1208_s14 = scalar_lea.sflag [#allocation5], %s134_s29 }
  0xf3   : > { %s136_s3 = scalar_lea.vmem [#allocation4], %s725_s30 }
  0xf4   : > { %s659_s5 = sshll.u32 %s136_s3, 4  ;;  %s1204_s5 = int_to_ptr.vmem [resolvable:$true] %s659_s5 }
  0xf5   : > { %420 = vrot.lane.b32.xlu1 %v398_v9, %s928_s23  ;;  %s859_s13 = scalar_lea.vmem %s1204_s5, 1024  ;;  %p866_p0 = scmp.lt.s32.totalorder %s1204_s5, %s864_s17 }
  0xf6   : > { %p860_p11 = scmp.ne.s32.totalorder %s1204_s5, %s859_s13  ;;  %p867_p1 = scmp.lt.s32.totalorder %s865_s21, %s859_s13 }
  0xf8   : > { %p861_p12 = pnand %p860_p11, %p986_p5  ;;  %p868_p2 = por %p867_p1, %p866_p0 }
  0xf9   : > { %469 = vrot.lane.b32.xlu1 %v350_v13, %s929_s28 }
  0xfa   : > { %p862_p13 = pneg %p861_p12 }
  0xfc   : > { %p869_p3 = pnand %p868_p2, %p862_p13 }
  0xfd   : > { %471 = vrot.lane.b32.xlu1 %v448_v14, %s929_s28 }
 0x123   : > { %v360_v15 = vpop.permute.xlu0 %359 }
 0x124   : > { %384 = vst.msk [vmem:[#allocation3] sm:$0xff] %vm383_vm6, %v360_v15 }
 0x12b   : > { %v362_v16 = vpop.permute.xlu0 %361 }
 0x12c   : > { %385 = vst.msk [vmem:[#allocation3 + $0x8] sm:$0xff] %vm383_vm6, %v362_v16 }
 0x12f   : > { %v409_v17 = vpop.permute.xlu0 %408 }
 0x130   : > { %433 = vst.msk [vmem:[#allocation3] sm:$0xff] %vm432_vm7, %v409_v17 }
 0x133   : > { %v411_v18 = vpop.permute.xlu0 %410 }
 0x134   : > { %434 = vst.msk [vmem:[#allocation3 + $0x8] sm:$0xff] %vm432_vm7, %v411_v18 }
 0x137   : > { %v458_v19 = vpop.permute.xlu0 %457 }
 0x138   : > { %482 = vst.msk [vmem:[#allocation3] sm:$0xff] %vm481_vm8, %v458_v19 }
 0x13b   : > { %v460_v20 = vpop.permute.xlu0 %459 }
 0x13c   : > { %483 = vst.msk [vmem:[#allocation3 + $0x8] sm:$0xff] %vm481_vm8, %v460_v20 }
 0x13f   : > { %v364_v21 = vpop.permute.xlu0 %363  ;;  %v490_v22 = vld [vmem:[#allocation3] sm:$0xff] }
 0x140   : > { %386 = vst.msk [vmem:[#allocation3 + $0x10] sm:$0xff] %vm383_vm6, %v364_v21  ;;  %775 = vmatprep.mubr.msk.f32.mxu0 %vm506_vm9, %v490_v22 }
 0x143   : > { %v423_v23 = vpop.permute.xlu1 %422  ;;  %v366_v24 = vpop.permute.xlu0 %365  ;;  %v491_v25 = vld [vmem:[#allocation3 + $0x8] sm:$0xff] }
 0x144   : > { %387 = vst.msk [vmem:[#allocation3 + $0x18] sm:$0xff] %vm383_vm6, %v366_v24  ;;  %776 = vmatmul.mubr.msk.f32.vlgmr.msra.gmra.mrb[0].mxu0 %vm506_vm9, %v491_v25 }
 0x147   : > { %v368_v26 = vpop.permute.xlu1 %367  ;;  %v413_v27 = vpop.permute.xlu0 %412 }
 0x148   : > { %388 = vst.msk [vmem:[#allocation3 + $0x20] sm:$0xff] %vm383_vm6, %v368_v26 }
 0x149   : > { %435 = vst.msk [vmem:[#allocation3 + $0x10] sm:$0xff] %vm432_vm7, %v413_v27 }
 0x14b   : > { %v370_v28 = vpop.permute.xlu1 %369  ;;  %v415_v29 = vpop.permute.xlu0 %414 }
 0x14c   : > { %389 = vst.msk [vmem:[#allocation3 + $0x28] sm:$0xff] %vm383_vm6, %v370_v28 }
 0x14d   : > { %436 = vst.msk [vmem:[#allocation3 + $0x18] sm:$0xff] %vm432_vm7, %v415_v29 }
 0x14f   : > { %v417_v30 = vpop.permute.xlu1 %416  ;;  %v462_v31 = vpop.permute.xlu0 %461 }
 0x150   : > { %437 = vst.msk [vmem:[#allocation3 + $0x20] sm:$0xff] %vm432_vm7, %v417_v30 }
 0x151   : > { %484 = vst.msk [vmem:[#allocation3 + $0x10] sm:$0xff] %vm481_vm8, %v462_v31 }
 0x153   : > { %v419_v32 = vpop.permute.xlu1 %418  ;;  %v464_v33 = vpop.permute.xlu0 %463 }
 0x154   : > { %438 = vst.msk [vmem:[#allocation3 + $0x28] sm:$0xff] %vm432_vm7, %v419_v32 }
 0x155   : > { %485 = vst.msk [vmem:[#allocation3 + $0x18] sm:$0xff] %vm481_vm8, %v464_v33 }
 0x157   : > { %v466_v34 = vpop.permute.xlu1 %465 }
 0x158   : > { %v492_v35 = vld [vmem:[#allocation3 + $0x10] sm:$0xff]  ;;  %486 = vst.msk [vmem:[#allocation3 + $0x20] sm:$0xff] %vm481_vm8, %v466_v34 }
 0x159   : > { %778 = vmatprep.mubr.msk.f32.mxu0 %vm506_vm9, %v492_v35 }
 0x15b   : > { %v468_v36 = vpop.permute.xlu1 %467 }
 0x15c   : > { %v493_v37 = vld [vmem:[#allocation3 + $0x18] sm:$0xff]  ;;  %487 = vst.msk [vmem:[#allocation3 + $0x28] sm:$0xff] %vm481_vm8, %v468_v36 }
 0x15d   : > { %779 = vmatmul.mubr.msk.f32.gmra.mrb[2].mxu0 %vm506_vm9, %v493_v37 }
 0x15f   : > { %v372_v38 = vpop.permute.xlu1 %371  ;;  %v494_v39 = vld [vmem:[#allocation3 + $0x20] sm:$0xff] }
 0x160   : > { %390 = vst.msk [vmem:[#allocation3 + $0x30] sm:$0xff] %vm383_vm6, %v372_v38  ;;  %781 = vmatprep.mubr.msk.f32.mxu1 %vm506_vm9, %v494_v39 }
 0x163   : > { %v374_v40 = vpop.permute.xlu1 %373  ;;  %v495_v41 = vld [vmem:[#allocation3 + $0x28] sm:$0xff] }
 0x164   : > { %391 = vst.msk [vmem:[#allocation3 + $0x38] sm:$0xff] %vm383_vm6, %v374_v40  ;;  %782 = vmatmul.mubr.msk.f32.vlgmr.msra.gmra.mrb[0].mxu1 %vm506_vm9, %v495_v41 }
 0x165   : > { %440 = vst.msk [vmem:[#allocation3 + $0x38] sm:$0xff] %vm432_vm7, %v423_v23 }
 0x167   : > { %v421_v42 = vpop.permute.xlu1 %420 }
 0x168   : > { %439 = vst.msk [vmem:[#allocation3 + $0x30] sm:$0xff] %vm432_vm7, %v421_v42 }
 0x16b   : > { %v470_v43 = vpop.permute.xlu1 %469 }
 0x16c   : > { %488 = vst.msk [vmem:[#allocation3 + $0x30] sm:$0xff] %vm481_vm8, %v470_v43 }
 0x16f   : > { %v472_v44 = vpop.permute.xlu1 %471 }
 0x170   : > { %489 = vst.msk [vmem:[#allocation3 + $0x38] sm:$0xff] %vm481_vm8, %v472_v44 }
 0x173   : > { %v496_v45 = vld [vmem:[#allocation3 + $0x30] sm:$0xff] }
 0x174   : > { %784 = vmatprep.mubr.msk.f32.mxu1 %vm506_vm9, %v496_v45 }
 0x177   : > { %v497_v46 = vld [vmem:[#allocation3 + $0x38] sm:$0xff] }
 0x178   : > { %785 = vmatmul.mubr.msk.f32.gmra.mrb[2].mxu1 %vm506_vm9, %v497_v46 }
 0x217   : > { %v777_v47 = vpop.f32.mrb[0].mxu0 }
 0x218   : > { %638 = vst.msk [vmem:[%s136_s3 + $0x8] sm:$0xff] %vm636_vm10, %v777_v47  ;;  %v597_v48 = vpop.f32.mrb[1].mxu0 }
 0x219   : > { %637 = vst.msk [vmem:[%s136_s3] sm:$0xff] %vm636_vm10, %v597_v48 }
 0x230   : > { %v780_v49 = vpop.f32.mrb[2].mxu0 }
 0x231   : > { %640 = vst.msk [vmem:[%s136_s3 + $0x18] sm:$0xff] %vm636_vm10, %v780_v49  ;;  %v607_v50 = vpop.f32.mrb[3].mxu0 }
 0x232   : > { %639 = vst.msk [vmem:[%s136_s3 + $0x10] sm:$0xff] %vm636_vm10, %v607_v50 }
 0x237   : > { %v783_v51 = vpop.f32.mrb[0].mxu1 }
 0x238   : > { %642 = vst.msk [vmem:[%s136_s3 + $0x28] sm:$0xff] %vm636_vm10, %v783_v51  ;;  %v617_v52 = vpop.f32.mrb[1].mxu1 }
 0x239   : > { %641 = vst.msk [vmem:[%s136_s3 + $0x20] sm:$0xff] %vm636_vm10, %v617_v52 }
 0x24b   : > { %v786_v53 = vpop.f32.mrb[2].mxu1 }
 0x24c   : > { %644 = vst.msk [vmem:[%s136_s3 + $0x38] sm:$0xff] %vm636_vm10, %v786_v53  ;;  %v627_v54 = vpop.f32.mrb[3].mxu1 }
 0x24d   : > { %643 = vst.msk [vmem:[%s136_s3 + $0x30] sm:$0xff] %vm636_vm10, %v627_v54 }
 0x24e   : > { %872 = shalt.err (!%p869_p3)
}
 0x24f   : > { %s873_s22 = scalar_lea.hbm %s1202_s8, 1024  ;;  %s877_s25 = scalar_lea.hbm %s1251_s2, 2048 }
 0x250   : > { %p874_p4 = scmp.ne.s32.totalorder %s1202_s8, %s873_s22  ;;  %p878_p9 = scmp.lt.u32.totalorder %s1202_s8, %s1251_s2 }
 0x251   : > { %p879_p10 = scmp.lt.u32.totalorder %s877_s25, %s873_s22  ;;  %p881_p12 = scmp.lt.u32.totalorder %s873_s22, %s1202_s8 }
 0x252   : > { %p875_p7 = pnand %p874_p4, %p986_p5 }
 0x253   : > { %p880_p11 = por %p879_p10, %p878_p9 }
 0x254   : > { %p876_p8 = pneg %p875_p7 }
 0x255   : > { %p882_p13 = por %p881_p12, %p880_p11 }
 0x257   : > { %p883_p0 = pnand %p882_p13, %p876_p8 }
 0x259   : > { %886 = shalt.err (!%p883_p0)
}
 0x25a   : > { %s931_s28 = smov 128   ;;  %s932_s29 = smov 8  }
 0x25b   : > { %811 = dma.vmem_to_hbm [thread:$0]  (%p986_p5), %s1204_s5, 1024, %s1202_s8, %s1208_s14, %s931_s28, %s931_s28, %s932_s29  }
 0x25c PF: > { %p817_p1 = scmp.ge.s32.totalorder %s921_s12, 2  ;;  %s674_s30 = sand.u32 1, %s909_s9  }
 0x25d   : > { %s675_s3 = scalar_lea.sflag [#allocation5], %s674_s30 }
 0x25e   : > { %p814_p2 = pnand %p817_p1, %p990_p6 }
 0x260   : > { %904 = dma.done.wait (!%p814_p2), %s675_s3, 1024  }
 0x261   : > { %906 = vsyncadd (!%p814_p2), %s675_s3, 4294966272  ;;  %p12_p3 = scmp.ge.s32.totalorder %s973_s15, 4   ;;  %s1254_s9 = smov %s913_s10 }
 0x262   : > { %s1255_s10 = smov %s917_s11  ;;  %s1256_s11 = smov %s984_s18 }
 0x263   : > { %s1257_s12 = smov %s973_s15  ;;  %14 = sbr.rel (!%p12_p3) target bundleno = 3 (0x3), region = 64 }
 0x26a   :  { %680 = vsyncpa [#allocation5], 1 }
 0x26b   :  { %682 = vsyncpa [#allocation5 + $0x1], 1 }

</bundles_post_ra>
